<compile_context>
chip_gen: v7x
topology: tpu7x:2x2x1
jax: 0.10.0
libtpu: 0.0.40
codegen_flags: <defaults>
</compile_context>

<pallas_src>
import math
import jax
import jax.numpy as jnp
from jax.experimental import pallas as pl
from jax.experimental.pallas import tpu as pltpu


# ---------------------------------------------------------------------------
# Kernel
# ---------------------------------------------------------------------------
def _mlp_kernel(x_ref, *refs):
    """Fused tanh-MLP in batch-on-lanes layout.

    refs = (w0, b0, w1, b1, ..., wL, bL, out_ref)
      x_ref : (d_in, tile_n)   activations, batch on the 128-lane axis
      w_i   : (out_i, in_i)
      b_i   : (out_i, 1)       broadcast along lanes
      out   : (d_out, tile_n)

    INVARIANT: lanes (batch columns) are never reduced over -- every output
    lane depends only on its own input lane, so unspecified data in pad
    lanes of a partial edge tile cannot contaminate valid lanes, and the
    partial-edge store is masked by Pallas.
    """
    out_ref = refs[-1]
    params = refs[:-1]
    n_layers = len(params) // 2

    h = x_ref[...].astype(jnp.float32)                   # (d_in, tile_n)
    for i in range(n_layers):
        w = params[2 * i][...].astype(jnp.float32)       # (out, in)
        b = params[2 * i + 1][...].astype(jnp.float32)   # (out, 1)
        if w.shape[1] == 1:
            # K == 1 contraction (scalar-input first layer): VPU broadcast
            # multiply (outer product) instead of a degenerate MXU matmul.
            z = w * h + b                                 # (out, tile_n)
        elif w.shape[0] == 1:
            # M == 1 contraction (scalar-output head): VPU multiply +
            # sublane reduce; avoids a 1/8-sublane-occupancy MXU push/pop.
            z = jnp.sum(w.reshape(-1, 1) * h, axis=0, keepdims=True) + b
        else:
            z = jnp.dot(w, h, preferred_element_type=jnp.float32) + b
        h = jnp.tanh(z) if i < n_layers - 1 else z        # tanh on hidden only
    out_ref[...] = h.astype(out_ref.dtype)


# ---------------------------------------------------------------------------
# Device queries (best-effort, with safe fallbacks)
# ---------------------------------------------------------------------------
def _round_up(n, m):
    return ((n + m - 1) // m) * m


def _device_kind():
    try:
        return jax.devices()[0].device_kind.lower()
    except Exception:
        return ""


def _num_tensorcores():
    """How many TensorCores share this kernel's grid (v7x: 2, v5e/v6e: 1)."""
    try:
        info = pltpu.get_tpu_info()
        for name in ("num_cores", "core_count", "num_tensorcores", "tensorcore_count"):
            v = getattr(info, name, None)
            if isinstance(v, int) and v >= 1:
                return v
    except Exception:
        pass
    kind = _device_kind()
    if "v7" in kind:
        return 2
    return 1


def _vmem_capacity_bytes():
    try:
        info = pltpu.get_tpu_info()
        v = getattr(info, "vmem_capacity_bytes", None)
        if isinstance(v, int) and v > 0:
            return v
    except Exception:
        pass
    kind = _device_kind()
    if "v7" in kind:
        return 64 << 20      # v7x: 64 MiB per TC
    return 128 << 20         # v4/v5e/v6e: 128 MiB
    # conservative default handled above


def _pick_tile(n, num_cores, max_tile=1024):
    """Lane-axis batch tile.

    Single-TC chips (v5e/v6e): one grid step when the batch fits under
    max_tile (no pointless serial steps).  2-TC chips (v7x): balanced,
    even split so both cores finish together (avoid odd step counts).
    All tiles are multiples of 128 (lane-dense loads/stores).
    """
    n128 = _round_up(max(n, 1), 128)
    if num_cores >= 2 and n128 >= 256:
        s = 2
        while True:
            tile = _round_up(-(-n128 // s), 128)
            if tile <= max_tile:
                return tile
            s += 2
    return min(max_tile, n128)


# ---------------------------------------------------------------------------
# Wrapper
# ---------------------------------------------------------------------------
def mlp_forward(x, weights, biases, *, tile_n=None, max_tile=1024):
    """Fused MLP forward pass (Sequentialmodel.forward) as a Pallas TPU kernel.

    x:       [N, layers[0]]                    float32
    weights: list of [layers[i], layers[i+1]]  float32
    biases:  list of [1, layers[i+1]]          float32
    returns: [N, layers[-1]]                   float32
    """
    N, d_in = x.shape
    d_out = weights[-1].shape[1]
    widths = [d_in] + [int(w.shape[1]) for w in weights]
    max_width = max(widths)

    num_cores = _num_tensorcores()
    vmem_phys = _vmem_capacity_bytes()
    vmem_budget = vmem_phys // 2

    # Generation-aware VMEM clamp: ~6 live (max_width, tile_n) f32 slabs
    # (double-buffered I/O blocks + layer intermediates) must fit the budget.
    vmem_tile_cap = max(128, (vmem_budget // (max_width * 4 * 6)) // 128 * 128)

    if tile_n is None:
        tile_n = _pick_tile(N, num_cores, max_tile=max_tile)
    tile_n = min(tile_n, vmem_tile_cap)
    assert tile_n % 128 == 0

    grid = (pl.cdiv(N, tile_n),)

    # Batch-on-lanes layout.  No zero-pad materialization: Pallas handles
    # the partial edge tile (see kernel docstring invariant).  For d_in == 1
    # the transpose is effectively a free reshape.
    x_t = jnp.asarray(x, jnp.float32).T                   # (d_in, N)

    params = []
    in_specs = [pl.BlockSpec((d_in, tile_n), lambda i: (0, i))]
    for w, b in zip(weights, biases):
        w_t = jnp.asarray(w, jnp.float32).T               # (out, in)
        b_t = jnp.asarray(b, jnp.float32).T               # (out, 1)
        # Constant (0, 0) block index -> params stay resident in VMEM,
        # no per-step re-DMA.  (Single-buffering via pl.Buffered(1) is
        # negligible at these widths, so we keep default buffering for
        # maximum compatibility.)
        in_specs.append(pl.BlockSpec(w_t.shape, lambda i: (0, 0)))
        in_specs.append(pl.BlockSpec(b_t.shape, lambda i: (0, 0)))
        params.extend([w_t, b_t])

    out_spec = pl.BlockSpec((d_out, tile_n), lambda i: (0, i))

    # Advisory cost so XLA schedules this tiny custom call sensibly.
    flops = 2 * N * sum(int(w.shape[0]) * int(w.shape[1]) for w in weights)
    transcendentals = N * sum(int(w.shape[1]) for w in weights[:-1])  # tanh count
    bytes_accessed = 4 * (
        N * d_in + N * d_out
        + sum(int(w.shape[0]) * int(w.shape[1]) + int(w.shape[1]) for w in weights)
    )
    cost = pl.CostEstimate(
        flops=flops, transcendentals=transcendentals, bytes_accessed=bytes_accessed
    )

    out_t = pl.pallas_call(
        _mlp_kernel,
        out_shape=jax.ShapeDtypeStruct((d_out, N), jnp.float32),
        grid_spec=pltpu.PrefetchScalarGridSpec(
            num_scalar_prefetch=0,
            grid=grid,
            in_specs=in_specs,
            out_specs=out_spec,
        ),
        compiler_params=pltpu.CompilerParams(
            dimension_semantics=("parallel",),
            vmem_limit_bytes=int(vmem_budget),
        ),
        cost_estimate=cost,
    )(x_t, *params)

    return out_t.T                                        # back to [N, d_out]


# ---------------------------------------------------------------------------
# Reference / init (matches Sequentialmodel.__init__ xavier_normal_ + zeros_)
# ---------------------------------------------------------------------------
def init_params(layers, key):
    weights, biases = [], []
    for i in range(len(layers) - 1):
        fan_in, fan_out = layers[i], layers[i + 1]
        key, sub = jax.random.split(key)
        std = math.sqrt(2.0 / (fan_in + fan_out))  # xavier_normal_, gain=1.0
        w = std * jax.random.normal(sub, (fan_in, fan_out), dtype=jnp.float32)
        b = jnp.zeros((1, fan_out), dtype=jnp.float32)
        weights.append(w)
        biases.append(b)
    return weights, biases


def reference_forward(x, weights, biases):
    h = x
    for i in range(len(weights) - 1):
        h = jnp.tanh(h @ weights[i] + biases[i])
    return h @ weights[-1] + biases[-1]


if __name__ == "__main__":
    # Typical fPINN layer config: scalar in/out, small hidden widths.
    layers = [1, 32, 32, 32, 1]
    N = 256  # number of collocation points (batch)

    key = jax.random.PRNGKey(0)
    key, kx = jax.random.split(key)
    x = jax.random.uniform(
        kx, (N, layers[0]), dtype=jnp.float32, minval=-1.0, maxval=1.0
    )

    weights, biases = init_params(layers, key)

    out = mlp_forward(x, weights, biases)
    out = jax.block_until_ready(out)

    ref = reference_forward(x, weights, biases)
    assert out.shape == (N, layers[-1])
    assert jnp.allclose(out, ref, atol=1e-5, rtol=1e-5), "mismatch vs reference MLP"

    # TODO(synk): fractional-derivative helpers (jacobi_polynomial / a_j /
    # fra_term2 / compute / PDE / loss / training) are loss-time machinery
    # built around autograd, not part of forward(); not kernelized.
    print("KERNEL_OK")
</pallas_src>

<mosaic_0001>
module attributes {stable_mosaic.version = 11 : i64} {
  func.func @_mlp_kernel(%arg0: i32, %arg1: memref<1x256xf32, #tpu.memory_space<vmem>>, %arg2: memref<32x1xf32, #tpu.memory_space<vmem>>, %arg3: memref<32x1xf32, #tpu.memory_space<vmem>>, %arg4: memref<32x32xf32, #tpu.memory_space<vmem>>, %arg5: memref<32x1xf32, #tpu.memory_space<vmem>>, %arg6: memref<32x32xf32, #tpu.memory_space<vmem>>, %arg7: memref<32x1xf32, #tpu.memory_space<vmem>>, %arg8: memref<1x32xf32, #tpu.memory_space<vmem>>, %arg9: memref<1x1xf32, #tpu.memory_space<vmem>>, %arg10: memref<1x256xf32, #tpu.memory_space<vmem>>) attributes {dimension_semantics = [#tpu.dimension_semantics<parallel>], iteration_bounds = array<i64: 1>, scalar_prefetch = 0 : i64, scratch_operands = 0 : i64, tpu.core_type = #tpu.core_type<tc>, window_params = [{transform_indices = @transform_0, window_bounds = array<i64: 1, 256>}, {pipeline_mode = #tpu.pipeline_mode<synchronous>, transform_indices = @transform_1, window_bounds = array<i64: 32, 1>}, {pipeline_mode = #tpu.pipeline_mode<synchronous>, transform_indices = @transform_2, window_bounds = array<i64: 32, 1>}, {pipeline_mode = #tpu.pipeline_mode<synchronous>, transform_indices = @transform_3, window_bounds = array<i64: 32, 32>}, {pipeline_mode = #tpu.pipeline_mode<synchronous>, transform_indices = @transform_4, window_bounds = array<i64: 32, 1>}, {pipeline_mode = #tpu.pipeline_mode<synchronous>, transform_indices = @transform_5, window_bounds = array<i64: 32, 32>}, {pipeline_mode = #tpu.pipeline_mode<synchronous>, transform_indices = @transform_6, window_bounds = array<i64: 32, 1>}, {pipeline_mode = #tpu.pipeline_mode<synchronous>, transform_indices = @transform_7, window_bounds = array<i64: 1, 32>}, {pipeline_mode = #tpu.pipeline_mode<synchronous>, transform_indices = @transform_8, window_bounds = array<i64: 1, 1>}, {transform_indices = @transform_9, window_bounds = array<i64: 1, 256>}]} {
    %c0 = arith.constant 0 : index
    %c0_0 = arith.constant 0 : index
    %0 = vector.load %arg1[%c0, %c0_0] : memref<1x256xf32, #tpu.memory_space<vmem>>, vector<1x256xf32>
    %c0_1 = arith.constant 0 : index
    %c0_2 = arith.constant 0 : index
    %1 = vector.load %arg2[%c0_1, %c0_2] : memref<32x1xf32, #tpu.memory_space<vmem>>, vector<32x1xf32>
    %c0_3 = arith.constant 0 : index
    %c0_4 = arith.constant 0 : index
    %2 = vector.load %arg3[%c0_3, %c0_4] : memref<32x1xf32, #tpu.memory_space<vmem>>, vector<32x1xf32>
    %3 = vector.broadcast %1 : vector<32x1xf32> to vector<32x256xf32>
    %4 = vector.broadcast %0 : vector<1x256xf32> to vector<32x256xf32>
    %5 = arith.mulf %3, %4 : vector<32x256xf32>
    %6 = vector.broadcast %2 : vector<32x1xf32> to vector<32x256xf32>
    %7 = arith.addf %5, %6 : vector<32x256xf32>
    %8 = math.tanh %7 : vector<32x256xf32>
    %c0_5 = arith.constant 0 : index
    %c0_6 = arith.constant 0 : index
    %9 = vector.load %arg4[%c0_5, %c0_6] : memref<32x32xf32, #tpu.memory_space<vmem>>, vector<32x32xf32>
    %c0_7 = arith.constant 0 : index
    %c0_8 = arith.constant 0 : index
    %10 = vector.load %arg5[%c0_7, %c0_8] : memref<32x1xf32, #tpu.memory_space<vmem>>, vector<32x1xf32>
    %cst = arith.constant dense<0.000000e+00> : vector<32x256xf32>
    %11 = tpu.matmul %9, %8, %cst {dimension_numbers = #tpu.dot_dimension_numbers<[1], [0], [0], [1], [0, 0, 1, 1], [], []>} : vector<32x32xf32>, vector<32x256xf32>, vector<32x256xf32> -> vector<32x256xf32>
    %12 = vector.broadcast %10 : vector<32x1xf32> to vector<32x256xf32>
    %13 = arith.addf %11, %12 : vector<32x256xf32>
    %14 = math.tanh %13 : vector<32x256xf32>
    %c0_9 = arith.constant 0 : index
    %c0_10 = arith.constant 0 : index
    %15 = vector.load %arg6[%c0_9, %c0_10] : memref<32x32xf32, #tpu.memory_space<vmem>>, vector<32x32xf32>
    %c0_11 = arith.constant 0 : index
    %c0_12 = arith.constant 0 : index
    %16 = vector.load %arg7[%c0_11, %c0_12] : memref<32x1xf32, #tpu.memory_space<vmem>>, vector<32x1xf32>
    %cst_13 = arith.constant dense<0.000000e+00> : vector<32x256xf32>
    %17 = tpu.matmul %15, %14, %cst_13 {dimension_numbers = #tpu.dot_dimension_numbers<[1], [0], [0], [1], [0, 0, 1, 1], [], []>} : vector<32x32xf32>, vector<32x256xf32>, vector<32x256xf32> -> vector<32x256xf32>
    %18 = vector.broadcast %16 : vector<32x1xf32> to vector<32x256xf32>
    %19 = arith.addf %17, %18 : vector<32x256xf32>
    %20 = math.tanh %19 : vector<32x256xf32>
    %c0_14 = arith.constant 0 : index
    %c0_15 = arith.constant 0 : index
    %21 = vector.load %arg8[%c0_14, %c0_15] : memref<1x32xf32, #tpu.memory_space<vmem>>, vector<1x32xf32>
    %c0_16 = arith.constant 0 : index
    %c0_17 = arith.constant 0 : index
    %22 = vector.load %arg9[%c0_16, %c0_17] : memref<1x1xf32, #tpu.memory_space<vmem>>, vector<1x1xf32>
    %23 = vector.shape_cast %21 : vector<1x32xf32> to vector<32x1xf32>
    %24 = vector.broadcast %23 : vector<32x1xf32> to vector<32x256xf32>
    %25 = arith.mulf %24, %20 : vector<32x256xf32>
    %cst_18 = arith.constant dense<0.000000e+00> : vector<256xf32>
    %26 = vector.multi_reduction <add>, %25, %cst_18 [0] : vector<32x256xf32> to vector<256xf32>
    %27 = vector.shape_cast %26 : vector<256xf32> to vector<1x256xf32>
    %28 = vector.broadcast %22 : vector<1x1xf32> to vector<1x256xf32>
    %29 = arith.addf %27, %28 : vector<1x256xf32>
    %c0_19 = arith.constant 0 : index
    %c0_20 = arith.constant 0 : index
    %30 = vector.load %arg10[%c0_19, %c0_20] : memref<1x256xf32, #tpu.memory_space<vmem>>, vector<1x256xf32>
    tpu.vector_store %arg10[%c0_19, %c0_20], %29 {strides = array<i32>} : memref<1x256xf32, #tpu.memory_space<vmem>>, vector<1x256xf32>,
    return
  }
  func.func @transform_0(%arg0: i32) -> (i32, i32) {
    %c0_i32 = arith.constant 0 : i32
    %c0_i32_0 = arith.constant 0 : i32
    return %c0_i32, %arg0 : i32, i32
  }
  func.func @transform_1(%arg0: i32) -> (i32, i32) {
    %c0_i32 = arith.constant 0 : i32
    %c0_i32_0 = arith.constant 0 : i32
    %c0_i32_1 = arith.constant 0 : i32
    return %c0_i32, %c0_i32_0 : i32, i32
  }
  func.func @transform_2(%arg0: i32) -> (i32, i32) {
    %c0_i32 = arith.constant 0 : i32
    %c0_i32_0 = arith.constant 0 : i32
    %c0_i32_1 = arith.constant 0 : i32
    return %c0_i32, %c0_i32_0 : i32, i32
  }
  func.func @transform_3(%arg0: i32) -> (i32, i32) {
    %c0_i32 = arith.constant 0 : i32
    %c0_i32_0 = arith.constant 0 : i32
    %c0_i32_1 = arith.constant 0 : i32
    return %c0_i32, %c0_i32_0 : i32, i32
  }
  func.func @transform_4(%arg0: i32) -> (i32, i32) {
    %c0_i32 = arith.constant 0 : i32
    %c0_i32_0 = arith.constant 0 : i32
    %c0_i32_1 = arith.constant 0 : i32
    return %c0_i32, %c0_i32_0 : i32, i32
  }
  func.func @transform_5(%arg0: i32) -> (i32, i32) {
    %c0_i32 = arith.constant 0 : i32
    %c0_i32_0 = arith.constant 0 : i32
    %c0_i32_1 = arith.constant 0 : i32
    return %c0_i32, %c0_i32_0 : i32, i32
  }
  func.func @transform_6(%arg0: i32) -> (i32, i32) {
    %c0_i32 = arith.constant 0 : i32
    %c0_i32_0 = arith.constant 0 : i32
    %c0_i32_1 = arith.constant 0 : i32
    return %c0_i32, %c0_i32_0 : i32, i32
  }
  func.func @transform_7(%arg0: i32) -> (i32, i32) {
    %c0_i32 = arith.constant 0 : i32
    %c0_i32_0 = arith.constant 0 : i32
    %c0_i32_1 = arith.constant 0 : i32
    return %c0_i32, %c0_i32_0 : i32, i32
  }
  func.func @transform_8(%arg0: i32) -> (i32, i32) {
    %c0_i32 = arith.constant 0 : i32
    %c0_i32_0 = arith.constant 0 : i32
    %c0_i32_1 = arith.constant 0 : i32
    return %c0_i32, %c0_i32_0 : i32, i32
  }
  func.func @transform_9(%arg0: i32) -> (i32, i32) {
    %c0_i32 = arith.constant 0 : i32
    %c0_i32_0 = arith.constant 0 : i32
    return %c0_i32, %arg0 : i32, i32
  }
}

</mosaic_0001>

<bundles_post_ra>
// kernel: tpu_custom_call.1
= control target key start
LH: loop header
LB: loop body
LE: loop exit
PB: predicated region body
PF: predicated region fallthrough
CT: control target
= control target key end

     0   :  { %s1118_s0 = inlined_call_operand.hbm [shape: f32[1,256], index: 0, kind: input, shape index: {}]   ;;  %s1119_s1 = inlined_call_operand.hbm [shape: f32[32,1], index: 1, kind: input, shape index: {}]   ;;  %s1120_s2 = inlined_call_operand.hbm [shape: f32[32,1], index: 2, kind: input, shape index: {}]   ;;  %s1121_s3 = inlined_call_operand.hbm [shape: f32[32,32], index: 3, kind: input, shape index: {}]   ;;  %s1122_s4 = inlined_call_operand.hbm [shape: f32[32,1], index: 4, kind: input, shape index: {}]   ;;  %s1123_s5 = inlined_call_operand.hbm [shape: f32[32,32], index: 5, kind: input, shape index: {}]   ;;  %s1124_s6 = inlined_call_operand.hbm [shape: f32[32,1], index: 6, kind: input, shape index: {}]   ;;  %s1125_s7 = inlined_call_operand.hbm [shape: f32[1,32], index: 7, kind: input, shape index: {}]   ;;  %s1126_s8 = inlined_call_operand.<no memory space> [shape: f32[1,1], index: 8, kind: input, shape index: {}]   ;;  %s1127_s9 = inlined_call_operand.hbm [shape: f32[1,256], index: 9, kind: output, shape index: {}]  }
   0x1   :  { %v14_v0 = vstv %s1126_s8 }
   0x2   :  { %15 = vst [vmem:[#allocation2] sm:$0x1] %v14_v0 }
   0x3   :  { %16 = vsyncpa [#allocation4], 0 }
   0x4   :  { %17 = vsyncpa [#allocation7], 0 }
   0x5   :  { %18 = vsyncpa [#allocation10], 0 }
   0x6   :  { %19 = vsyncpa [#allocation13], 0 }
   0x7   :  { %20 = vsyncpa [#allocation16], 0 }
   0x8   :  { %21 = vsyncpa [#allocation5], 0  ;;  %s898_s11 = smov [#allocation6]   ;;  %s688_s15 = scalar_lea.hbm %s1119_s1, 512 }
   0x9   :  { %s37_s12 = sshll.u32 %s898_s11, 4  ;;  %p689_p0 = scmp.ne.s32.totalorder %s1119_s1, %s688_s15  ;;  %s38_s12 = int_to_ptr.vmem [resolvable:$true] %s37_s12 }
   0xa   :  { %p692_p1 = scmp.lt.u32.totalorder %s688_s15, %s1119_s1 }
   0xc   :  { %p694_p2 = pnand %p692_p1, %p689_p0 }
   0xe   :  { %697 = shalt.err (!%p694_p2)
}
   0xf   :  { %s698_s19 = scalar_lea.vmem %s38_s12, 512  ;;  %p703_p4 = scmp.lt.s32.totalorder %s38_s12, %s38_s12 }
  0x10   :  { %p699_p3 = scmp.ne.s32.totalorder %s38_s12, %s698_s19  ;;  %p704_p5 = scmp.lt.s32.totalorder %s698_s19, %s698_s19 }
  0x12   :  { %p705_p6 = por %p704_p5, %p703_p4 }
  0x14   :  { %p706_p7 = pnand %p705_p6, %p699_p3 }
  0x16   :  { %709 = shalt.err (!%p706_p7)
}
  0x17   :  { %s899_s20 = smov 128   ;;  %s900_s21 = smov 8  }
  0x18   :  { %43 = dma.hbm_to_vmem [thread:$0]  %s1119_s1, 512, %s38_s12, [#allocation7], %s899_s20, %s899_s20, %s900_s21  }
  0x19   :  { %s901_s24 = smov [#allocation9]   ;;  %s902_s26 = smov [#allocation12]  }
  0x1a   :  { %s61_s25 = sshll.u32 %s901_s24, 4  ;;  %s85_s27 = sshll.u32 %s902_s26, 4  ;;  %s62_s25 = int_to_ptr.vmem [resolvable:$true] %s61_s25  ;;  %s86_s27 = int_to_ptr.vmem [resolvable:$true] %s85_s27 }
  0x1b   :  { %s710_s30 = scalar_lea.hbm %s1121_s3, 512 }
  0x1c   :  { %p711_p8 = scmp.ne.s32.totalorder %s1121_s3, %s710_s30  ;;  %p714_p9 = scmp.lt.u32.totalorder %s710_s30, %s1121_s3 }
  0x1e   :  { %p716_p10 = pnand %p714_p9, %p711_p8 }
  0x20   :  { %719 = shalt.err (!%p716_p10)
}
  0x21   :  { %s720_s1 = scalar_lea.vmem %s62_s25, 512  ;;  %p725_p12 = scmp.lt.s32.totalorder %s62_s25, %s62_s25 }
  0x22   :  { %p721_p11 = scmp.ne.s32.totalorder %s62_s25, %s720_s1  ;;  %p726_p13 = scmp.lt.s32.totalorder %s720_s1, %s720_s1 }
  0x24   :  { %p727_p0 = por %p726_p13, %p725_p12 }
  0x26   :  { %p728_p1 = pnand %p727_p0, %p721_p11 }
  0x28   :  { %731 = shalt.err (!%p728_p1)
}
  0x29   :  { %67 = dma.hbm_to_vmem [thread:$0]  %s1121_s3, 512, %s62_s25, [#allocation10], %s899_s20, %s899_s20, %s900_s21  }
  0x2a   :  { %s732_s18 = scalar_lea.hbm %s1123_s5, 512 }
  0x2b   :  { %p733_p2 = scmp.ne.s32.totalorder %s1123_s5, %s732_s18  ;;  %p736_p3 = scmp.lt.u32.totalorder %s732_s18, %s1123_s5 }
  0x2d   :  { %p738_p4 = pnand %p736_p3, %p733_p2 }
  0x2f   :  { %741 = shalt.err (!%p738_p4)
}
  0x30   :  { %s742_s24 = scalar_lea.vmem %s86_s27, 512  ;;  %p747_p6 = scmp.lt.s32.totalorder %s86_s27, %s86_s27 }
  0x31   :  { %p743_p5 = scmp.ne.s32.totalorder %s86_s27, %s742_s24  ;;  %p748_p7 = scmp.lt.s32.totalorder %s742_s24, %s742_s24 }
  0x33   :  { %p749_p8 = por %p748_p7, %p747_p6 }
  0x35   :  { %p750_p9 = pnand %p749_p8, %p743_p5 }
  0x37   :  { %753 = shalt.err (!%p750_p9)
}
  0x38   :  { %91 = dma.hbm_to_vmem [thread:$0]  %s1123_s5, 512, %s86_s27, [#allocation13], %s899_s20, %s899_s20, %s900_s21  }
  0x39   :  { %s903_s26 = smov [#allocation3]   ;;  %s904_s29 = smov [#allocation8]  }
  0x3a   :  { %s28_s28 = sshll.u32 %s903_s26, 4  ;;  %s49_s30 = sshll.u32 %s904_s29, 4  ;;  %s29_s28 = int_to_ptr.vmem [resolvable:$true] %s28_s28  ;;  %s50_s30 = int_to_ptr.vmem [resolvable:$true] %s49_s30 }
  0x3b   :  { %s754_s13 = scalar_lea.hbm %s1118_s0, 32 }
  0x3c   :  { %p755_p10 = scmp.ne.s32.totalorder %s1118_s0, %s754_s13  ;;  %p758_p11 = scmp.lt.u32.totalorder %s754_s13, %s1118_s0 }
  0x3e   :  { %p760_p12 = pnand %p758_p11, %p755_p10 }
  0x40   :  { %763 = shalt.err (!%p760_p12)
}
  0x41   :  { %s764_s5 = scalar_lea.vmem %s29_s28, 32  ;;  %p769_p0 = scmp.lt.s32.totalorder %s29_s28, %s29_s28 }
  0x42   :  { %p765_p13 = scmp.ne.s32.totalorder %s29_s28, %s764_s5  ;;  %p770_p1 = scmp.lt.s32.totalorder %s764_s5, %s764_s5 }
  0x44   :  { %p771_p2 = por %p770_p1, %p769_p0 }
  0x46   :  { %p772_p3 = pnand %p771_p2, %p765_p13 }
  0x48   :  { %775 = shalt.err (!%p772_p3)
}
  0x49   :  { %31 = dma.hbm_to_vmem [thread:$0]  %s1118_s0, 32, %s29_s28, [#allocation4]  }
  0x4a   :  { %s776_s8 = scalar_lea.hbm %s1120_s2, 512 }
  0x4b   :  { %p777_p4 = scmp.ne.s32.totalorder %s1120_s2, %s776_s8  ;;  %p780_p5 = scmp.lt.u32.totalorder %s776_s8, %s1120_s2 }
  0x4d   :  { %p782_p6 = pnand %p780_p5, %p777_p4 }
  0x4f   :  { %785 = shalt.err (!%p782_p6)
}
  0x50   :  { %s786_s3 = scalar_lea.vmem %s50_s30, 512  ;;  %p791_p8 = scmp.lt.s32.totalorder %s50_s30, %s50_s30 }
  0x51   :  { %p787_p7 = scmp.ne.s32.totalorder %s50_s30, %s786_s3  ;;  %p792_p9 = scmp.lt.s32.totalorder %s786_s3, %s786_s3 }
  0x53   :  { %p793_p10 = por %p792_p9, %p791_p8 }
  0x55   :  { %p794_p11 = pnand %p793_p10, %p787_p7 }
  0x57   :  { %797 = shalt.err (!%p794_p11)
}
  0x58   :  { %55 = dma.hbm_to_vmem [thread:$0]  %s1120_s2, 512, %s50_s30, [#allocation7], %s899_s20, %s899_s20, %s900_s21  }
  0x59   :  { %s905_s26 = smov [#allocation11]   ;;  %s906_s29 = smov [#allocation14]  }
  0x5a   :  { %s73_s28 = sshll.u32 %s905_s26, 4  ;;  %s97_s10 = sshll.u32 %s906_s29, 4  ;;  %s74_s28 = int_to_ptr.vmem [resolvable:$true] %s73_s28  ;;  %s98_s10 = int_to_ptr.vmem [resolvable:$true] %s97_s10 }
  0x5b   :  { %s798_s14 = scalar_lea.hbm %s1122_s4, 512 }
  0x5c   :  { %p799_p12 = scmp.ne.s32.totalorder %s1122_s4, %s798_s14  ;;  %p802_p13 = scmp.lt.u32.totalorder %s798_s14, %s1122_s4 }
  0x5e   :  { %p804_p0 = pnand %p802_p13, %p799_p12 }
  0x60   :  { %807 = shalt.err (!%p804_p0)
}
  0x61   :  { %s808_s2 = scalar_lea.vmem %s74_s28, 512  ;;  %p813_p2 = scmp.lt.s32.totalorder %s74_s28, %s74_s28 }
  0x62   :  { %p809_p1 = scmp.ne.s32.totalorder %s74_s28, %s808_s2  ;;  %p814_p3 = scmp.lt.s32.totalorder %s808_s2, %s808_s2 }
  0x64   :  { %p815_p4 = por %p814_p3, %p813_p2 }
  0x66   :  { %p816_p5 = pnand %p815_p4, %p809_p1 }
  0x68   :  { %819 = shalt.err (!%p816_p5)
}
  0x69   :  { %79 = dma.hbm_to_vmem [thread:$0]  %s1122_s4, 512, %s74_s28, [#allocation10], %s899_s20, %s899_s20, %s900_s21  }
  0x6a   :  { %s820_s18 = scalar_lea.hbm %s1124_s6, 512 }
  0x6b   :  { %p821_p6 = scmp.ne.s32.totalorder %s1124_s6, %s820_s18  ;;  %p824_p7 = scmp.lt.u32.totalorder %s820_s18, %s1124_s6 }
  0x6d   :  { %p826_p8 = pnand %p824_p7, %p821_p6 }
  0x6f   :  { %829 = shalt.err (!%p826_p8)
}
  0x70   :  { %s830_s24 = scalar_lea.vmem %s98_s10, 512  ;;  %p835_p10 = scmp.lt.s32.totalorder %s98_s10, %s98_s10 }
  0x71   :  { %p831_p9 = scmp.ne.s32.totalorder %s98_s10, %s830_s24  ;;  %p836_p11 = scmp.lt.s32.totalorder %s830_s24, %s830_s24 }
  0x73   :  { %p837_p12 = por %p836_p11, %p835_p10 }
  0x75   :  { %p838_p13 = pnand %p837_p12, %p831_p9 }
  0x77   :  { %841 = shalt.err (!%p838_p13)
}
  0x78   :  { %103 = dma.hbm_to_vmem [thread:$0]  %s1124_s6, 512, %s98_s10, [#allocation13], %s899_s20, %s899_s20, %s900_s21  }
  0x79   :  { %s907_s0 = smov [#allocation15]   ;;  %s842_s29 = scalar_lea.hbm %s1125_s7, 16 }
  0x7a   :  { %s110_s25 = sshll.u32 %s907_s0, 4  ;;  %p843_p0 = scmp.ne.s32.totalorder %s1125_s7, %s842_s29  ;;  %s111_s25 = int_to_ptr.vmem [resolvable:$true] %s110_s25 }
  0x7b   :  { %p846_p1 = scmp.lt.u32.totalorder %s842_s29, %s1125_s7 }
  0x7d   :  { %p848_p2 = pnand %p846_p1, %p843_p0 }
  0x7f   :  { %851 = shalt.err (!%p848_p2)
}
  0x80   :  { %s852_s12 = scalar_lea.vmem %s111_s25, 16  ;;  %s856_s6 = scalar_lea.vmem %s111_s25, 32 }
  0x81   :  { %p853_p3 = scmp.ne.s32.totalorder %s111_s25, %s852_s12  ;;  %p857_p4 = scmp.lt.s32.totalorder %s111_s25, %s111_s25 }
  0x82   :  { %p858_p5 = scmp.lt.s32.totalorder %s856_s6, %s852_s12 }
  0x84   :  { %p859_p6 = por %p858_p5, %p857_p4 }
  0x86   :  { %p860_p7 = pnand %p859_p6, %p853_p3 }
  0x88   :  { %863 = shalt.err (!%p860_p7)
}
  0x89   :  { %113 = dma.hbm_to_vmem [thread:$0]  %s1125_s7, 16, %s111_s25, [#allocation16]  }
  0x8a   :  { %886 = dma.done.wait [#allocation4], 32  }
  0x8b   :  { %887 = vsyncadd [#allocation4], 4294967264 }
  0x8c   :  { %888 = dma.done.wait [#allocation7], 1024  }
  0x8d   :  { %889 = vsyncadd [#allocation7], 4294966272 }
  0x8e   :  { %890 = dma.done.wait [#allocation10], 1024  }
  0x8f   :  { %891 = vsyncadd [#allocation10], 4294966272 }
  0x90   :  { %892 = dma.done.wait [#allocation13], 1024  }
  0x91   :  { %893 = vsyncadd [#allocation13], 4294966272 }
  0x92   :  { %894 = dma.done.wait [#allocation16], 16  }
  0x93   :  { %895 = vsyncadd [#allocation16], 4294967280  ;;  %v908_v1 = vmov 0   ;;  %v145_v2 = vld [vmem:[#allocation8] sm:$0xff]  ;;  %v146_v4 = vld [vmem:[#allocation8 + $0x8] sm:$0xff]  ;;  %v909_v19 = vmov 0.0   ;;  %v170_v21 = vlaneseq }
  0x94   :  { %639 = vset.pattern.permute.xlu1 %v908_v1  ;;  %638 = vset.pattern.permute.xlu0 %v908_v1  ;;  %v141_v3 = vld [vmem:[#allocation6] sm:$0xff]  ;;  %v142_v5 = vld [vmem:[#allocation6 + $0x8] sm:$0xff]  ;;  %v144_v6 = vld [vmem:[#allocation6 + $0x18] sm:$0xff]  ;;  %vm252_vm0 = vcmask 261120   ;;  %s911_s7 = smov [#allocation17]  }
  0x95   :  { %190 = vperm.xlu1 %639, %v145_v2   ;;  %151 = vperm.xlu0 %638, %v141_v3   ;;  %v143_v7 = vld [vmem:[#allocation6 + $0x10] sm:$0xff]  ;;  %v148_v8 = vld [vmem:[#allocation8 + $0x18] sm:$0xff]  ;;  %v229_v10 = vld [vmem:[#allocation11 + $0x8] sm:$0xff]  ;;  %v1082_v22 = vshrl.u32 %v170_v21, 7  ;;  %s586_s10 = sshll.u32 %s911_s7, 4  ;;  %vm577_vm1 = vcmp.lt.s32.totalorder %v170_v21, 256  ;;  %s587_s10 = int_to_ptr.vmem [resolvable:$true] %s586_s10 }
  0x96   :  { %v147_v9 = vld [vmem:[#allocation8 + $0x10] sm:$0xff]  ;;  %v228_v11 = vld [vmem:[#allocation11] sm:$0xff]  ;;  %v231_v12 = vld [vmem:[#allocation11 + $0x18] sm:$0xff]  ;;  %329 = vmatprep.mubr.f32.mxu0 %v909_v19  ;;  %466 = vmatprep.mubr.f32.mxu1 %v909_v19  ;;  %s864_s15 = scalar_lea.vmem %s587_s10, 32  ;;  %p869_p9 = scmp.lt.s32.totalorder %s587_s10, %s587_s10 }
  0x97   :  { %v230_v13 = vld [vmem:[#allocation11 + $0x10] sm:$0xff]  ;;  %v367_v14 = vld [vmem:[#allocation14 + $0x8] sm:$0xff]  ;;  %v366_v15 = vld [vmem:[#allocation14] sm:$0xff]  ;;  %v172_v23 = vsub.s32 0, %v1082_v22  ;;  %v176_v24 = vsub.s32 1, %v1082_v22  ;;  %p865_p8 = scmp.ne.s32.totalorder %s587_s10, %s864_s15  ;;  %p870_p10 = scmp.lt.s32.totalorder %s864_s15, %s864_s15 }
  0x98   :  { %v369_v16 = vld [vmem:[#allocation14 + $0x18] sm:$0xff]  ;;  %v368_v17 = vld [vmem:[#allocation14 + $0x10] sm:$0xff]  ;;  %v607_v18 = vld [vmem:[#allocation15] ss:$0 sm:$0xff] }
  0x99   :  { %195 = vperm.xlu1 %639, %v146_v4   ;;  %156 = vperm.xlu0 %638, %v142_v5   ;;  %v500_v20 = vld [vmem:[#allocation2] sm:$0x1]  ;;  %v140_v25 = vld [vmem:[#allocation3] sm:$0x3]  ;;  %v224_v0 = vld [vmem:[#allocation9] sm:$0xff]  ;;  %p871_p11 = por %p870_p10, %p869_p9 }
  0x9a   :  { %v173_v26 = vrot.slane %v140_v25, %v172_v23  ;;  %v177_v27 = vrot.slane %v140_v25, %v176_v24  ;;  %v225_v1 = vld [vmem:[#allocation9 + $0x8] sm:$0xff]  ;;  %v226_v2 = vld [vmem:[#allocation9 + $0x10] sm:$0xff]  ;;  %v227_v3 = vld [vmem:[#allocation9 + $0x18] sm:$0xff] }
  0x9b   :  { %p872_p12 = pnand %p871_p11, %p865_p8 }
  0x9d   :  { %166 = vperm.xlu1 %639, %v144_v6   ;;  %161 = vperm.xlu0 %638, %v143_v7  }
  0xa1   :  { %205 = vperm.xlu1 %639, %v148_v8   ;;  %200 = vperm.xlu0 %638, %v147_v9  }
  0xa5   :  { %239 = vperm.xlu1 %639, %v229_v10   ;;  %234 = vperm.xlu0 %638, %v228_v11  }
  0xa9   :  { %249 = vperm.xlu1 %639, %v231_v12   ;;  %244 = vperm.xlu0 %638, %v230_v13  }
  0xad   :  { %377 = vperm.xlu1 %639, %v367_v14   ;;  %372 = vperm.xlu0 %638, %v366_v15  }
  0xb1   :  { %387 = vperm.xlu1 %639, %v369_v16   ;;  %382 = vperm.xlu0 %638, %v368_v17  }
  0xb5   :  { %506 = vbcast.lane.b32.xlu0 %v607_v18, 256  ;;  %510 = vbcast.lane.b32.xlu1 %v607_v18, 264 }
  0xb9   :  { %514 = vbcast.lane.b32.xlu0 %v607_v18, 272  ;;  %518 = vbcast.lane.b32.xlu1 %v607_v18, 280 }
  0xbd   :  { %548 = vperm.xlu0 %638, %v500_v20  }
 0x114   :  { %v191_v28 = vpop.permute.xlu1 %190  ;;  %v152_v29 = vpop.permute.xlu0 %151 }
 0x115   :  { %v180_v30 = vmul.f32 %v173_v26, %v152_v29  ;;  %v181_v31 = vmul.f32 %v177_v27, %v152_v29 }
 0x117   :  { %v208_v32 = vadd.f32 %v191_v28, %v180_v30  ;;  %v209_v33 = vadd.f32 %v191_v28, %v181_v31 }
 0x118   :  { %v196_v34 = vpop.permute.xlu1 %195  ;;  %v157_v35 = vpop.permute.xlu0 %156 }
 0x119   :  { %v182_v36 = vmul.f32 %v173_v26, %v157_v35  ;;  %v183_v37 = vmul.f32 %v177_v27, %v157_v35  ;;  %640 = vtanh.f32 %v208_v32 }
 0x11a   :  { %642 = vtanh.f32 %v209_v33 }
 0x11b   :  { %v210_v38 = vadd.f32 %v196_v34, %v182_v36  ;;  %v211_v39 = vadd.f32 %v196_v34, %v183_v37 }
 0x11c   :  { %v167_v40 = vpop.permute.xlu1 %166  ;;  %v162_v41 = vpop.permute.xlu0 %161 }
 0x11d   :  { %644 = vtanh.f32 %v210_v38  ;;  %v186_v42 = vmul.f32 %v173_v26, %v167_v40  ;;  %v187_v43 = vmul.f32 %v177_v27, %v167_v40  ;;  %v184_v44 = vmul.f32 %v173_v26, %v162_v41  ;;  %v362_v40 = vld [vmem:[#allocation12] sm:$0xff] }
 0x11e   :  { %646 = vtanh.f32 %v211_v39  ;;  %v185_v45 = vmul.f32 %v177_v27, %v162_v41  ;;  %v363_v41 = vld [vmem:[#allocation12 + $0x8] sm:$0xff] }
 0x120   :  { %v206_v46 = vpop.permute.xlu1 %205  ;;  %v201_v47 = vpop.permute.xlu0 %200 }
 0x121   :  { %v214_v48 = vadd.f32 %v206_v46, %v186_v42  ;;  %v215_v49 = vadd.f32 %v206_v46, %v187_v43  ;;  %v212_v50 = vadd.f32 %v201_v47, %v184_v44  ;;  %v213_v51 = vadd.f32 %v201_v47, %v185_v45  ;;  %v364_v42 = vld [vmem:[#allocation12 + $0x10] sm:$0xff]  ;;  %v365_v43 = vld [vmem:[#allocation12 + $0x18] sm:$0xff] }
 0x123   :  { %648 = vtanh.f32 %v214_v48  ;;  %v641_v52 = vpop.eup %640 }
 0x124   :  { %650 = vtanh.f32 %v215_v49  ;;  %v643_v53 = vpop.eup %642  ;;  %v235_v4 = vpop.permute.xlu0 %234 }
 0x125   :  { %652 = vtanh.f32 %v212_v50  ;;  %v240_v9 = vpop.permute.xlu1 %239 }
 0x126   :  { %654 = vtanh.f32 %v213_v51 }
 0x127   :  { %v645_v54 = vpop.eup %644 }
 0x128   :  { %v647_v55 = vpop.eup %646  ;;  %v610_v56 = vpack.c.bf16 %v645_v54, %v641_v52  ;;  %v245_v14 = vpop.permute.xlu0 %244 }
 0x129   :  { %v608_v57 = vpack.c.bf16 %v647_v55, %v643_v53  ;;  %v250_v20 = vpop.permute.xlu1 %249 }
 0x12b   :  { %609 = vmatprep.subr.bf16.mxu0 %v608_v57 }
 0x12c   :  { %611 = vmatpush1.bf16.msra.mxu0 %v610_v56  ;;  %v373_v44 = vpop.permute.xlu0 %372 }
 0x12d   :  { %v649_v58 = vpop.eup %648  ;;  %v378_v49 = vpop.permute.xlu1 %377 }
 0x12e   :  { %v651_v59 = vpop.eup %650 }
 0x12f   :  { %v653_v60 = vpop.eup %652 }
 0x130   :  { %v655_v61 = vpop.eup %654  ;;  %v614_v62 = vpack.c.bf16 %v649_v58, %v653_v60  ;;  %v383_v54 = vpop.permute.xlu0 %382 }
 0x131   :  { %v612_v63 = vpack.c.bf16 %v651_v59, %v655_v61  ;;  %v388_v58 = vpop.permute.xlu1 %387 }
 0x133   :  { %613 = vmatprep.subr.bf16.mxu0 %v612_v63 }
 0x134   :  { %615 = vmatpush1.bf16.msra.mxu0 %v614_v62 }
 0x137   :  { %599 = vmatmul.mubr.msk.f32.vlgmr.msra.gmra.mrb[0].mxu0 %vm252_vm0, %v224_v0  ;;  %v507_v0 = vpop.permute.xlu0 %506 }
 0x138   :  { %335 = vmatprep.mubr.f32.mxu0 %v909_v19 }
 0x13b   :  { %600 = vmatmul.mubr.msk.f32.gmra.mrb[2].mxu0 %vm252_vm0, %v225_v1  ;;  %v511_v1 = vpop.permute.xlu1 %510 }
 0x13c   :  { %341 = vmatprep.mubr.f32.mxu0 %v909_v19 }
 0x13f   :  { %601 = vmatmul.mubr.msk.f32.gmra.mrb[4].mxu0 %vm252_vm0, %v226_v2 }
 0x140   :  { %347 = vmatprep.mubr.f32.mxu0 %v909_v19 }
 0x143   :  { %602 = vmatmul.mubr.msk.f32.gmra.mrb[6].mxu0 %vm252_vm0, %v227_v3 }
 0x20a   :  { %v331_v5 = vpop.f32.mrb[0].mxu0 }
 0x20b   :  { %v332_v6 = vadd.f32 %v331_v5, %v235_v4  ;;  %v333_v7 = vpop.f32.mrb[1].mxu0 }
 0x20c   :  { %v334_v8 = vadd.f32 %v333_v7, %v235_v4 }
 0x20d   :  { %656 = vtanh.f32 %v332_v6 }
 0x20e   :  { %v337_v10 = vpop.f32.mrb[2].mxu0  ;;  %658 = vtanh.f32 %v334_v8 }
 0x20f   :  { %v338_v11 = vadd.f32 %v337_v10, %v240_v9  ;;  %v339_v12 = vpop.f32.mrb[3].mxu0 }
 0x210   :  { %v340_v13 = vadd.f32 %v339_v12, %v240_v9 }
 0x211   :  { %660 = vtanh.f32 %v338_v11  ;;  %v515_v11 = vpop.permute.xlu0 %514 }
 0x212   :  { %662 = vtanh.f32 %v340_v13  ;;  %v343_v15 = vpop.f32.mrb[4].mxu0 }
 0x213   :  { %v344_v16 = vadd.f32 %v343_v15, %v245_v14  ;;  %v345_v17 = vpop.f32.mrb[5].mxu0  ;;  %v519_v15 = vpop.permute.xlu1 %518 }
 0x214   :  { %v346_v18 = vadd.f32 %v345_v17, %v245_v14 }
 0x215   :  { %664 = vtanh.f32 %v344_v16 }
 0x216   :  { %v349_v24 = vpop.f32.mrb[6].mxu0  ;;  %666 = vtanh.f32 %v346_v18 }
 0x217   :  { %v350_v25 = vadd.f32 %v349_v24, %v250_v20  ;;  %v351_v26 = vpop.f32.mrb[7].mxu0  ;;  %v657_v28 = vpop.eup %656 }
 0x218   :  { %v352_v27 = vadd.f32 %v351_v26, %v250_v20  ;;  %v659_v29 = vpop.eup %658 }
 0x219   :  { %668 = vtanh.f32 %v350_v25 }
 0x21a   :  { %670 = vtanh.f32 %v352_v27 }
 0x21b   :  { %v661_v30 = vpop.eup %660 }
 0x21c   :  { %v663_v31 = vpop.eup %662  ;;  %v618_v32 = vpack.c.bf16 %v661_v30, %v657_v28 }
 0x21d   :  { %v616_v33 = vpack.c.bf16 %v663_v31, %v659_v29 }
 0x21f   :  { %617 = vmatprep.subr.bf16.mxu1 %v616_v33  ;;  %v665_v34 = vpop.eup %664 }
 0x220   :  { %619 = vmatpush1.bf16.msra.mxu1 %v618_v32  ;;  %v667_v35 = vpop.eup %666 }
 0x223   :  { %v669_v36 = vpop.eup %668 }
 0x224   :  { %v671_v37 = vpop.eup %670  ;;  %v622_v38 = vpack.c.bf16 %v669_v36, %v665_v34 }
 0x225   :  { %v620_v39 = vpack.c.bf16 %v671_v37, %v667_v35  ;;  %v910_v35 = vmov 1966171168  }
 0x226   :  { %v561_v36 = vunpack.c.l.s4 %v910_v35 }
 0x227   :  { %621 = vmatprep.subr.bf16.mxu1 %v620_v39 }
 0x228   :  { %623 = vmatpush1.bf16.msra.mxu1 %v622_v38  ;;  %v549_v38 = vpop.permute.xlu0 %548 }
 0x22b   :  { %603 = vmatmul.mubr.msk.f32.vlgmr.msra.gmra.mrb[0].mxu1 %vm252_vm0, %v362_v40 }
 0x22c   :  { %472 = vmatprep.mubr.f32.mxu1 %v909_v19 }
 0x22f   :  { %604 = vmatmul.mubr.msk.f32.gmra.mrb[2].mxu1 %vm252_vm0, %v363_v41 }
 0x230   :  { %478 = vmatprep.mubr.f32.mxu1 %v909_v19 }
 0x233   :  { %605 = vmatmul.mubr.msk.f32.gmra.mrb[4].mxu1 %vm252_vm0, %v364_v42  ;;  %v562_v42 = vunpack.c.0.s8 %v561_v36 }
 0x234   :  { %484 = vmatprep.mubr.f32.mxu1 %v909_v19 }
 0x237   :  { %606 = vmatmul.mubr.msk.f32.gmra.mrb[6].mxu1 %vm252_vm0, %v365_v43  ;;  %v554_v43 = vrot.slane %v549_v38, %v172_v23 }
 0x2fe   :  { %v468_v45 = vpop.f32.mrb[0].mxu1 }
 0x2ff   :  { %v469_v46 = vadd.f32 %v468_v45, %v373_v44  ;;  %v470_v47 = vpop.f32.mrb[1].mxu1 }
 0x300   :  { %v471_v48 = vadd.f32 %v470_v47, %v373_v44 }
 0x301   :  { %672 = vtanh.f32 %v469_v46 }
 0x302   :  { %v474_v50 = vpop.f32.mrb[2].mxu1  ;;  %674 = vtanh.f32 %v471_v48  ;;  %v565_v48 = vsub.s32 %v562_v42, %v1082_v22 }
 0x303   :  { %v475_v51 = vadd.f32 %v474_v50, %v378_v49  ;;  %v476_v52 = vpop.f32.mrb[3].mxu1 }
 0x304   :  { %v477_v53 = vadd.f32 %v476_v52, %v378_v49 }
 0x305   :  { %676 = vtanh.f32 %v475_v51 }
 0x306   :  { %678 = vtanh.f32 %v477_v53  ;;  %v480_v55 = vpop.f32.mrb[4].mxu1 }
 0x307   :  { %v481_v19 = vadd.f32 %v480_v55, %v383_v54  ;;  %v482_v56 = vpop.f32.mrb[5].mxu1 }
 0x308   :  { %v483_v57 = vadd.f32 %v482_v56, %v383_v54 }
 0x309   :  { %680 = vtanh.f32 %v481_v19 }
 0x30a   :  { %682 = vtanh.f32 %v483_v57  ;;  %v486_v59 = vpop.f32.mrb[6].mxu1 }
 0x30b   :  { %v487_v60 = vadd.f32 %v486_v59, %v388_v58  ;;  %v488_v61 = vpop.f32.mrb[7].mxu1  ;;  %v673_v63 = vpop.eup %672 }
 0x30c   :  { %v489_v62 = vadd.f32 %v488_v61, %v388_v58  ;;  %v675_v2 = vpop.eup %674  ;;  %v520_v5 = vmul.f32 %v673_v63, %v507_v0 }
 0x30d   :  { %684 = vtanh.f32 %v487_v60  ;;  %v521_v7 = vmul.f32 %v675_v2, %v507_v0 }
 0x30e   :  { %686 = vtanh.f32 %v489_v62 }
 0x30f   :  { %v677_v3 = vpop.eup %676 }
 0x310   :  { %v679_v4 = vpop.eup %678  ;;  %v522_v6 = vmul.f32 %v677_v3, %v511_v1 }
 0x311   :  { %v523_v8 = vmul.f32 %v679_v4, %v511_v1 }
 0x312   :  { %v528_v9 = vadd.f32 %v522_v6, %v520_v5 }
 0x313   :  { %v681_v10 = vpop.eup %680  ;;  %v537_v12 = vadd.f32 %v523_v8, %v521_v7 }
 0x314   :  { %v683_v13 = vpop.eup %682  ;;  %v524_v14 = vmul.f32 %v681_v10, %v515_v11 }
 0x315   :  { %v525_v16 = vmul.f32 %v683_v13, %v515_v11 }
 0x316   :  { %v529_v17 = vadd.f32 %v528_v9, %v524_v14 }
 0x317   :  { %v685_v18 = vpop.eup %684  ;;  %v538_v20 = vadd.f32 %v537_v12, %v525_v16 }
 0x318   :  { %v687_v24 = vpop.eup %686  ;;  %v526_v25 = vmul.f32 %v685_v18, %v519_v15 }
 0x319   :  { %v527_v26 = vmul.f32 %v687_v24, %v519_v15 }
 0x31a   :  { %v530_v27 = vadd.f32 %v529_v17, %v526_v25 }
 0x31b   :  { %v539_v28 = vadd.f32 %v538_v20, %v527_v26 }
 0x31c   :  { %v531_v29 = vrot.slane %v530_v27, 4 }
 0x31d   :  { %v540_v30 = vrot.slane %v539_v28, 4 }
 0x31e   :  { %v532_v31 = vadd.f32 %v531_v29, %v530_v27 }
 0x31f   :  { %v541_v32 = vadd.f32 %v540_v30, %v539_v28 }
 0x320   :  { %v533_v33 = vrot.slane %v532_v31, 2 }
 0x321   :  { %v542_v34 = vrot.slane %v541_v32, 2 }
 0x322   :  { %v534_v37 = vadd.f32 %v533_v33, %v532_v31 }
 0x323   :  { %v543_v39 = vadd.f32 %v542_v34, %v541_v32 }
 0x324   :  { %v535_v40 = vrot.slane %v534_v37, 1 }
 0x325   :  { %v544_v41 = vrot.slane %v543_v39, 1 }
 0x326   :  { %v536_v44 = vadd.f32 %v535_v40, %v534_v37 }
 0x327   :  { %v545_v45 = vadd.f32 %v544_v41, %v543_v39 }
 0x328   :  { %v555_v46 = vadd.f32 %v554_v43, %v536_v44 }
 0x329   :  { %v556_v47 = vadd.f32 %v554_v43, %v545_v45 }
 0x32b   :  { %v559_v49 = vcombine.low %v555_v46, %v556_v47 }
 0x32d   :  { %v566_v50 = vrot.slane %v559_v49, %v565_v48 }
 0x32f   :  { %v573_v51 = vrot.slane %v566_v50, %v565_v48 }
 0x331   :  { %579 = vst.msk [vmem:[#allocation17] sm:$0x3] %vm577_vm1, %v573_v51 }
 0x332   :  { %875 = shalt.err (!%p872_p12)
}
 0x333   :  { %s876_s30 = scalar_lea.hbm %s1127_s9, 32 }
 0x334   :  { %p877_p13 = scmp.ne.s32.totalorder %s1127_s9, %s876_s30  ;;  %p880_p0 = scmp.lt.u32.totalorder %s876_s30, %s1127_s9 }
 0x336   :  { %p882_p1 = pnand %p880_p0, %p877_p13 }
 0x338   :  { %885 = shalt.err (!%p882_p1)
}
 0x339   :  { %589 = dma.vmem_to_hbm [thread:$0]  %s587_s10, 32, %s1127_s9, [#allocation5]  }
 0x33a   :  { %896 = dma.done.wait [#allocation5], 32  }
 0x33b   :  { %897 = vsyncadd [#allocation5], 4294967264 }
 0x33c   :  { %593 = vsyncpa [#allocation4], 1 }
 0x33d   :  { %594 = vsyncpa [#allocation7], 1 }
 0x33e   :  { %595 = vsyncpa [#allocation10], 1 }
 0x33f   :  { %596 = vsyncpa [#allocation13], 1 }
 0x340   :  { %597 = vsyncpa [#allocation16], 1 }
 0x341   :  { %598 = vsyncpa [#allocation5], 1 }

</bundles_post_ra>
